<compile_context>
chip_gen: v5e
topology: v5e:2x2
jax: 0.10.0
libtpu: 0.0.40
codegen_flags: <defaults>
</compile_context>

<pallas_src>
import math

import jax
import jax.numpy as jnp
from jax.experimental import pallas as pl
from jax.experimental.pallas import tpu as pltpu


def _round_up(x, m):
    return ((x + m - 1) // m) * m


def _pick_tk(f_pad, tk_max):
    """Largest multiple of 128 that divides f_pad and is <= tk_max (>= 128)."""
    units = f_pad // 128
    best = 1
    for d in range(1, units + 1):
        if units % d == 0 and d * 128 <= tk_max:
            best = d
    return best * 128


def _vmem_capacity_bytes():
    """Physical VMEM of the local TPU; conservative 64 MiB fallback (v7x)."""
    try:
        info = pltpu.get_tpu_info()
        cap = getattr(info, "vmem_capacity_bytes", None)
        if cap:
            return int(cap)
    except Exception:
        pass
    return 64 * 1024 * 1024


# ----------------------------------------------------------------------------
# Kernels
# ----------------------------------------------------------------------------
def _expert_kernel_f32(x_ref, w1_ref, b1_ref, w2_ref, b2_ref, o_ref):
    """f32 output: accumulate directly into the (k-resident) output block."""
    k = pl.program_id(1)

    @pl.when(k == 0)
    def _():
        # Fold the second-layer bias into the accumulator init (added once).
        o_ref[...] = jnp.broadcast_to(b2_ref[...], o_ref.shape)

    # hidden tile: relu(x @ W1[:, k-tile] + b1[k-tile]); bf16 MXU operands,
    # f32 accumulation; bias add + ReLU stay f32 on the VPU.
    h = jnp.dot(x_ref[...], w1_ref[...], preferred_element_type=jnp.float32)
    h = jnp.maximum(h + b1_ref[...], 0.0)
    o_ref[...] += jnp.dot(h.astype(w2_ref.dtype), w2_ref[...],
                          preferred_element_type=jnp.float32)


def _expert_kernel_acc(x_ref, w1_ref, b1_ref, w2_ref, b2_ref, o_ref, acc_ref):
    """Non-f32 output: f32 VMEM accumulator, cast to out dtype on last k step."""
    k = pl.program_id(1)

    @pl.when(k == 0)
    def _():
        acc_ref[...] = jnp.broadcast_to(b2_ref[...], acc_ref.shape)

    h = jnp.dot(x_ref[...], w1_ref[...], preferred_element_type=jnp.float32)
    h = jnp.maximum(h + b1_ref[...], 0.0)
    acc_ref[...] += jnp.dot(h.astype(w2_ref.dtype), w2_ref[...],
                            preferred_element_type=jnp.float32)

    @pl.when(k == pl.num_programs(1) - 1)
    def _():
        o_ref[...] = acc_ref[...].astype(o_ref.dtype)


# ----------------------------------------------------------------------------
# Wrapper
# ----------------------------------------------------------------------------
def prepare_expert_params(w1, b1, w2, b2):
    """Pad feature axes to multiples of 128 and cast MXU operands to bf16.

    Call ONCE at init; hoists the per-call weight pad/cast out of the hot path.
      w1: (d_model, d_ff), b1: (d_ff,), w2: (d_ff, output_dim), b2: (output_dim,)
    """
    d_model, d_ff = w1.shape
    output_dim = w2.shape[1]
    D_pad = _round_up(d_model, 128)
    F_pad = _round_up(d_ff, 128)
    O_pad = _round_up(output_dim, 128)

    w1_p = jnp.zeros((D_pad, F_pad), jnp.bfloat16).at[:d_model, :d_ff].set(
        w1.astype(jnp.bfloat16))
    b1_p = jnp.zeros((1, F_pad), jnp.float32).at[0, :d_ff].set(
        b1.astype(jnp.float32))
    w2_p = jnp.zeros((F_pad, O_pad), jnp.bfloat16).at[:d_ff, :output_dim].set(
        w2.astype(jnp.bfloat16))
    b2_p = jnp.zeros((1, O_pad), jnp.float32).at[0, :output_dim].set(
        b2.astype(jnp.float32))
    return w1_p, b1_p, w2_p, b2_p


def expert_forward(x, w1_p, b1_p, w2_p, b2_p, output_dim, *, tm=None, tk=512):
    """x: (..., d_model) -> (..., output_dim). Uses params from prepare_expert_params."""
    orig_shape = x.shape
    d_model = orig_shape[-1]
    out_dtype = x.dtype

    D_pad, F_pad = w1_p.shape
    O_pad = w2_p.shape[1]

    x2d = x.reshape(-1, d_model)
    M = x2d.shape[0]

    # ---------------- generation-aware tile sizing ----------------
    cap = _vmem_capacity_bytes()
    budget = int(cap * 0.75)            # ~96 MiB on v5e/v6e, ~48 MiB on v7x
    if tm is None:
        # Big M tiles amortize W1/W2 HBM streaming (weights are re-read once
        # per M tile); v7x (64 MiB VMEM, faster HBM) gets a smaller default.
        tm = 1024 if cap >= 100 * 1024 * 1024 else 512
    multi_core = cap < 100 * 1024 * 1024  # v7x heuristic: 2 TensorCores/chip

    TK = _pick_tk(F_pad, max(tk, 128))    # divides F_pad exactly (no dead cols)
    TM = min(tm, _round_up(M, 16))        # 16: bf16 sublane packing
    if multi_core and M > 16:
        # Ensure >= 2 M tiles so both TensorCores get work for small batches.
        TM = min(TM, _round_up((M + 1) // 2, 16))
    TM = max(TM, 16)

    use_scratch = out_dtype != jnp.float32
    out_bytes = jnp.dtype(out_dtype).itemsize

    def vmem_est(TM_, TK_):
        est = 2 * TM_ * D_pad * 2            # x tile (double-buffered bf16)
        est += 2 * D_pad * TK_ * 2           # W1 panel
        est += 2 * TK_ * 4                   # b1 slice
        est += 2 * TK_ * O_pad * 2           # W2 panel
        est += 2 * O_pad * 4                 # b2
        est += 2 * TM_ * O_pad * out_bytes   # output tile
        if use_scratch:
            est += TM_ * O_pad * 4           # f32 accumulator scratch
        est += TM_ * TK_ * (4 + 2)           # hidden tile f32 + bf16 temporaries
        return est

    # Auto-shrink if the footprint exceeds the generation budget.
    while vmem_est(TM, TK) > budget:
        if TK > 128:
            TK = _pick_tk(F_pad, TK // 2)
        elif TM > 64:
            TM = max(64, _round_up(TM // 2, 16))
        else:
            break

    M_pad = _round_up(M, TM)
    n_m_tiles = M_pad // TM
    grid = (n_m_tiles, F_pad // TK)

    # ---------------- activation padding (skipped when aligned) ----------------
    if M_pad == M and D_pad == d_model:
        x_p = x2d.astype(jnp.bfloat16)
    else:
        x_p = jnp.zeros((M_pad, D_pad), jnp.bfloat16).at[:M, :d_model].set(
            x2d.astype(jnp.bfloat16))

    est = vmem_est(TM, TK)
    vmem_limit = int(min(max(est * 6 // 5 + (4 << 20), 32 << 20), budget))

    cost = pl.CostEstimate(
        flops=2 * M_pad * (D_pad * F_pad + F_pad * O_pad),
        transcendentals=0,
        # Weights are re-streamed once per M tile; count it honestly.
        bytes_accessed=(x_p.size * 2
                        + n_m_tiles * (w1_p.size * 2 + w2_p.size * 2)
                        + grid[0] * grid[1] * (TK + O_pad) * 4
                        + M_pad * O_pad * out_bytes),
    )

    in_specs = [
        pl.BlockSpec((TM, D_pad), lambda m, k: (m, 0)),   # x tile
        pl.BlockSpec((D_pad, TK), lambda m, k: (0, k)),   # W1 panel
        pl.BlockSpec((1, TK), lambda m, k: (0, k)),       # b1 slice
        pl.BlockSpec((TK, O_pad), lambda m, k: (k, 0)),   # W2 panel
        pl.BlockSpec((1, O_pad), lambda m, k: (0, 0)),    # b2
    ]
    out_spec = pl.BlockSpec((TM, O_pad), lambda m, k: (m, 0))

    kernel = _expert_kernel_acc if use_scratch else _expert_kernel_f32
    scratch = [pltpu.VMEM((TM, O_pad), jnp.float32)] if use_scratch else []

    out = pl.pallas_call(
        kernel,
        out_shape=jax.ShapeDtypeStruct((M_pad, O_pad), out_dtype),
        grid_spec=pltpu.PrefetchScalarGridSpec(
            num_scalar_prefetch=0,
            grid=grid,
            in_specs=in_specs,
            out_specs=out_spec,
            scratch_shapes=scratch,
        ),
        compiler_params=pltpu.CompilerParams(
            dimension_semantics=("parallel", "arbitrary"),
            vmem_limit_bytes=vmem_limit,
        ),
        cost_estimate=cost,
    )(x_p, w1_p, b1_p, w2_p, b2_p)

    out = out[:M, :output_dim]
    return out.reshape(*orig_shape[:-1], output_dim)


def init_expert_params(key, d_model, d_ff, output_dim, dtype=jnp.float32):
    """Deterministic init matching nn.Linear's default (uniform +/- 1/sqrt(fan_in))."""
    k1, k2, k3, k4 = jax.random.split(key, 4)
    bound1 = 1.0 / math.sqrt(d_model)
    bound2 = 1.0 / math.sqrt(d_ff)
    # stored as (in, out) so the kernel does x @ W
    w1 = jax.random.uniform(k1, (d_model, d_ff), dtype, -bound1, bound1)
    b1 = jax.random.uniform(k2, (d_ff,), dtype, -bound1, bound1)
    w2 = jax.random.uniform(k3, (d_ff, output_dim), dtype, -bound2, bound2)
    b2 = jax.random.uniform(k4, (output_dim,), dtype, -bound2, bound2)
    return w1, b1, w2, b2


if __name__ == "__main__":
    d_model, d_ff, output_dim = 32, 64, 32
    batch, seq = 2, 8

    key = jax.random.PRNGKey(0)
    kx, kp = jax.random.split(key)
    x = jax.random.normal(kx, (batch, seq, d_model), jnp.float32)
    w1, b1, w2, b2 = init_expert_params(kp, d_model, d_ff, output_dim)

    # Pad/cast the weights ONCE (hoisted out of the per-call hot path).
    w1_p, b1_p, w2_p, b2_p = prepare_expert_params(w1, b1, w2, b2)

    out = expert_forward(x, w1_p, b1_p, w2_p, b2_p, output_dim)
    out = jax.block_until_ready(out)

    # reference check in plain JAX (f32); loose tolerance because the kernel
    # feeds bf16 operands to the MXU (f32 accumulation).
    ref = jnp.maximum(x @ w1 + b1, 0.0) @ w2 + b2
    assert out.shape == (batch, seq, output_dim)
    err = float(jnp.max(jnp.abs(out - ref)))
    assert jnp.allclose(out, ref, atol=3e-2, rtol=3e-2), f"max abs err {err}"

    print("KERNEL_OK")
</pallas_src>

<mosaic_0001>
module attributes {stable_mosaic.version = 11 : i64} {
  func.func @_expert_kernel_f32(%arg0: i32, %arg1: i32, %arg2: memref<16x128xbf16, #tpu.memory_space<vmem>>, %arg3: memref<128x128xbf16, #tpu.memory_space<vmem>>, %arg4: memref<1x128xf32, #tpu.memory_space<vmem>>, %arg5: memref<128x128xbf16, #tpu.memory_space<vmem>>, %arg6: memref<1x128xf32, #tpu.memory_space<vmem>>, %arg7: memref<16x128xf32, #tpu.memory_space<vmem>>) attributes {dimension_semantics = [#tpu.dimension_semantics<parallel>, #tpu.dimension_semantics<arbitrary>], iteration_bounds = array<i64: 1, 1>, scalar_prefetch = 0 : i64, scratch_operands = 0 : i64, tpu.core_type = #tpu.core_type<tc>, window_params = [{transform_indices = @transform_0, window_bounds = array<i64: 16, 128>}, {transform_indices = @transform_1, window_bounds = array<i64: 128, 128>}, {transform_indices = @transform_2, window_bounds = array<i64: 1, 128>}, {transform_indices = @transform_3, window_bounds = array<i64: 128, 128>}, {pipeline_mode = #tpu.pipeline_mode<synchronous>, transform_indices = @transform_4, window_bounds = array<i64: 1, 128>}, {transform_indices = @transform_5, window_bounds = array<i64: 16, 128>}]} {
    %c0_i32 = arith.constant 0 : i32
    %0 = arith.cmpi eq, %arg1, %c0_i32 : i32
    %1 = arith.extui %0 : i1 to i32
    %c0_i32_0 = arith.constant 0 : i32
    %2 = arith.cmpi ne, %1, %c0_i32_0 : i32
    scf.if %2 {
      %c0_14 = arith.constant 0 : index
      %c0_15 = arith.constant 0 : index
      %17 = vector.load %arg6[%c0_14, %c0_15] : memref<1x128xf32, #tpu.memory_space<vmem>>, vector<1x128xf32>
      %18 = vector.shape_cast %17 : vector<1x128xf32> to vector<1x128xf32>
      %19 = vector.broadcast %18 : vector<1x128xf32> to vector<16x128xf32>
      %c0_16 = arith.constant 0 : index
      %c0_17 = arith.constant 0 : index
      %20 = vector.load %arg7[%c0_16, %c0_17] : memref<16x128xf32, #tpu.memory_space<vmem>>, vector<16x128xf32>
      tpu.vector_store %arg7[%c0_16, %c0_17], %19 {strides = array<i32>} : memref<16x128xf32, #tpu.memory_space<vmem>>, vector<16x128xf32>,
    } else {
    }
    %c0 = arith.constant 0 : index
    %c0_1 = arith.constant 0 : index
    %3 = vector.load %arg2[%c0, %c0_1] : memref<16x128xbf16, #tpu.memory_space<vmem>>, vector<16x128xbf16>
    %c0_2 = arith.constant 0 : index
    %c0_3 = arith.constant 0 : index
    %4 = vector.load %arg3[%c0_2, %c0_3] : memref<128x128xbf16, #tpu.memory_space<vmem>>, vector<128x128xbf16>
    %cst = arith.constant dense<0.000000e+00> : vector<16x128xf32>
    %5 = tpu.matmul %3, %4, %cst {dimension_numbers = #tpu.dot_dimension_numbers<[1], [0], [0], [1], [0, 0, 1, 1], [], []>} : vector<16x128xbf16>, vector<128x128xbf16>, vector<16x128xf32> -> vector<16x128xf32>
    %c0_4 = arith.constant 0 : index
    %c0_5 = arith.constant 0 : index
    %6 = vector.load %arg4[%c0_4, %c0_5] : memref<1x128xf32, #tpu.memory_space<vmem>>, vector<1x128xf32>
    %7 = vector.broadcast %6 : vector<1x128xf32> to vector<16x128xf32>
    %8 = arith.addf %5, %7 : vector<16x128xf32>
    %cst_6 = arith.constant 0.000000e+00 : f32
    %9 = vector.broadcast %cst_6 : f32 to vector<16x128xf32>
    %10 = arith.maximumf %8, %9 : vector<16x128xf32>
    %c0_7 = arith.constant 0 : index
    %c0_8 = arith.constant 0 : index
    %11 = vector.load %arg7[%c0_7, %c0_8] : memref<16x128xf32, #tpu.memory_space<vmem>>, vector<16x128xf32>
    %12 = arith.truncf %10 : vector<16x128xf32> to vector<16x128xbf16>
    %c0_9 = arith.constant 0 : index
    %c0_10 = arith.constant 0 : index
    %13 = vector.load %arg5[%c0_9, %c0_10] : memref<128x128xbf16, #tpu.memory_space<vmem>>, vector<128x128xbf16>
    %cst_11 = arith.constant dense<0.000000e+00> : vector<16x128xf32>
    %14 = tpu.matmul %12, %13, %cst_11 {dimension_numbers = #tpu.dot_dimension_numbers<[1], [0], [0], [1], [0, 0, 1, 1], [], []>} : vector<16x128xbf16>, vector<128x128xbf16>, vector<16x128xf32> -> vector<16x128xf32>
    %15 = arith.addf %11, %14 : vector<16x128xf32>
    %c0_12 = arith.constant 0 : index
    %c0_13 = arith.constant 0 : index
    %16 = vector.load %arg7[%c0_12, %c0_13] : memref<16x128xf32, #tpu.memory_space<vmem>>, vector<16x128xf32>
    tpu.vector_store %arg7[%c0_12, %c0_13], %15 {strides = array<i32>} : memref<16x128xf32, #tpu.memory_space<vmem>>, vector<16x128xf32>,
    return
  }
  func.func @transform_0(%arg0: i32, %arg1: i32) -> (i32, i32) {
    %c0_i32 = arith.constant 0 : i32
    %c0_i32_0 = arith.constant 0 : i32
    return %arg0, %c0_i32 : i32, i32
  }
  func.func @transform_1(%arg0: i32, %arg1: i32) -> (i32, i32) {
    %c0_i32 = arith.constant 0 : i32
    %c0_i32_0 = arith.constant 0 : i32
    return %c0_i32, %arg1 : i32, i32
  }
  func.func @transform_2(%arg0: i32, %arg1: i32) -> (i32, i32) {
    %c0_i32 = arith.constant 0 : i32
    %c0_i32_0 = arith.constant 0 : i32
    return %c0_i32, %arg1 : i32, i32
  }
  func.func @transform_3(%arg0: i32, %arg1: i32) -> (i32, i32) {
    %c0_i32 = arith.constant 0 : i32
    %c0_i32_0 = arith.constant 0 : i32
    return %arg1, %c0_i32 : i32, i32
  }
  func.func @transform_4(%arg0: i32, %arg1: i32) -> (i32, i32) {
    %c0_i32 = arith.constant 0 : i32
    %c0_i32_0 = arith.constant 0 : i32
    %c0_i32_1 = arith.constant 0 : i32
    return %c0_i32, %c0_i32_0 : i32, i32
  }
  func.func @transform_5(%arg0: i32, %arg1: i32) -> (i32, i32) {
    %c0_i32 = arith.constant 0 : i32
    %c0_i32_0 = arith.constant 0 : i32
    return %arg0, %c0_i32 : i32, i32
  }
}

</mosaic_0001>

<bundles_post_ra>
// kernel: tpu_custom_call.1
= control target key start
LH: loop header
LB: loop body
LE: loop exit
PB: predicated region body
PF: predicated region fallthrough
CT: control target
= control target key end

     0   :  { %10 = vsyncpa [#allocation3], 0  ;;  %s528_s0 = inlined_call_operand.hbm [shape: bf16[16,128], index: 0, kind: input, shape index: {}]   ;;  %s529_s1 = inlined_call_operand.hbm [shape: bf16[128,128], index: 1, kind: input, shape index: {}]   ;;  %s530_s2 = inlined_call_operand.vmem [shape: f32[1,128], index: 2, kind: input, shape index: {}]   ;;  %s531_s3 = inlined_call_operand.hbm [shape: bf16[128,128], index: 3, kind: input, shape index: {}]   ;;  %s532_s4 = inlined_call_operand.vmem [shape: f32[1,128], index: 4, kind: input, shape index: {}]   ;;  %s533_s5 = inlined_call_operand.hbm [shape: f32[16,128], index: 5, kind: output, shape index: {}]  }
   0x1   :  { %11 = vsyncpa [#allocation6], 0 }
   0x2   :  { %12 = vsyncpa [#allocation4], 0  ;;  %s30_s20 = sshll.u32 %s529_s1, 4  ;;  %s472_s21 = smov [#allocation5]   ;;  %s31_s20 = int_to_ptr.hbm [resolvable:$true] %s30_s20 }
   0x3   :  { %s32_s22 = sshll.u32 %s472_s21, 4  ;;  %s17_s25 = sshll.u32 %s528_s0, 4  ;;  %s33_s22 = int_to_ptr.vmem [resolvable:$true] %s32_s22  ;;  %s18_s25 = int_to_ptr.hbm [resolvable:$true] %s17_s25 }
   0x4   :  { %s473_s26 = smov 64   ;;  %s474_s27 = smov 4  }
   0x5   :  { %38 = dma.hbm_to_vmem [thread:$0]  %s31_s20, 1024, %s33_s22, [#allocation6], %s473_s26, %s473_s26, %s474_s27  }
   0x6   :  { %s475_s28 = smov [#allocation2]   ;;  %s45_s7 = sshll.u32 %s531_s3, 4  ;;  %s46_s7 = int_to_ptr.hbm [resolvable:$true] %s45_s7 }
   0x7   :  { %s19_s29 = sshll.u32 %s475_s28, 4  ;;  %s476_s1 = smov [#allocation7]   ;;  %s20_s29 = int_to_ptr.vmem [resolvable:$true] %s19_s29 }
   0x8   :  { %25 = dma.hbm_to_vmem [thread:$0]  %s18_s25, 128, %s20_s29, [#allocation3], %s473_s26, %s473_s26, %s474_s27  }
   0x9   :  { %s47_s8 = sshll.u32 %s476_s1, 4  ;;  %s48_s8 = int_to_ptr.vmem [resolvable:$true] %s47_s8 }
   0xa   :  { %53 = dma.hbm_to_vmem [thread:$0]  %s46_s7, 1024, %s48_s8, [#allocation6], %s473_s26, %s473_s26, %s474_s27  }
   0xb   :  { %466 = dma.done.wait [#allocation3], 128  }
   0xc   :  { %467 = vsyncadd [#allocation3], 4294967168 }
   0xd   :  { %468 = dma.done.wait [#allocation6], 2048  }
   0xe   :  { %469 = vsyncadd [#allocation6], 4294965248  ;;  %v351_v0 = vld [vmem:[#allocation5 + $0x38] sm:$0xff]  ;;  %v350_v1 = vld [vmem:[#allocation5 + $0x30] sm:$0xff]  ;;  %s477_s11 = smov [#allocation8]   ;;  %s478_s15 = smov 128  }
   0xf   :  { %154 = vmatpush.bf16.msra.mxu0 %v351_v0  ;;  %v359_v2 = vld [vmem:[#allocation7 + $0x38] sm:$0xff]  ;;  %v358_v3 = vld [vmem:[#allocation7 + $0x30] sm:$0xff]  ;;  %v349_v4 = vld [vmem:[#allocation5 + $0x28] sm:$0xff]  ;;  %s259_s12 = sshll.u32 %s477_s11, 4  ;;  %s479_s16 = smov 8   ;;  %s260_s12 = int_to_ptr.vmem [resolvable:$true] %s259_s12 }
  0x10   :  { %237 = vmatpush.bf16.msra.mxu1 %v359_v2  ;;  %v357_v5 = vld [vmem:[#allocation7 + $0x28] sm:$0xff]  ;;  %v348_v6 = vld [vmem:[#allocation5 + $0x20] sm:$0xff]  ;;  %v347_v8 = vld [vmem:[#allocation5 + $0x18] sm:$0xff] }
  0x11   :  { %v356_v7 = vld [vmem:[#allocation7 + $0x20] sm:$0xff]  ;;  %v346_v9 = vld [vmem:[#allocation5 + $0x10] sm:$0xff]  ;;  %v345_v10 = vld [vmem:[#allocation5 + $0x8] sm:$0xff] }
  0x12   :  { %v344_v11 = vld [vmem:[#allocation5] sm:$0xff]  ;;  %v343_v12 = vld [vmem:[#allocation2] sm:$0xff]  ;;  %v354_v14 = vld [vmem:[#allocation7 + $0x10] sm:$0xff] }
  0x13   :  { %155 = vmatpush.bf16.msra.mxu0 %v350_v1  ;;  %v355_v13 = vld [vmem:[#allocation7 + $0x18] sm:$0xff]  ;;  %v353_v15 = vld [vmem:[#allocation7 + $0x8] sm:$0xff]  ;;  %v352_v16 = vld [vmem:[#allocation7] sm:$0xff] }
  0x14   :  { %238 = vmatpush.bf16.msra.mxu1 %v358_v3  ;;  %v368_v18 = vld [vmem:[%s530_s2] ss:$0 sm:$0xff]  ;;  %s261_s2 = sshll.u32 %s533_s5, 4  ;;  %s262_s2 = int_to_ptr.hbm [resolvable:$true] %s261_s2 }
  0x15   :  { %v369_v25 = vld [vmem:[%s532_s4] ss:$0 sm:$0xff] }
  0x17   :  { %156 = vmatpush.bf16.msra.mxu0 %v349_v4 }
  0x18   :  { %239 = vmatpush.bf16.msra.mxu1 %v357_v5 }
  0x1b   :  { %157 = vmatpush.bf16.msra.mxu0 %v348_v6 }
  0x1c   :  { %240 = vmatpush.bf16.msra.mxu1 %v356_v7 }
  0x1f   :  { %158 = vmatpush.bf16.msra.mxu0 %v347_v8 }
  0x20   :  { %241 = vmatpush.bf16.msra.mxu1 %v355_v13 }
  0x23   :  { %159 = vmatpush.bf16.msra.mxu0 %v346_v9 }
  0x24   :  { %242 = vmatpush.bf16.msra.mxu1 %v354_v14 }
  0x27   :  { %160 = vmatpush.bf16.msra.mxu0 %v345_v10 }
  0x28   :  { %243 = vmatpush.bf16.msra.mxu1 %v353_v15 }
  0x2b   :  { %161 = vmatpush.bf16.msra.mxu0 %v344_v11 }
  0x2c   :  { %244 = vmatpush.bf16.msra.mxu1 %v352_v16 }
  0x2e   :  { %162 = vmatmul.bf16.vlgmr.msra.gmra.mxu0 %v343_v12 }
  0xab   :  { %v163_v17 = vpop.f32.mrf.mxu0 }
  0xac   :  { %v164_v19 = vadd.f32 %v368_v18, %v163_v17 }
  0xae   :  { %v168_v22 = vmax.f32 %v164_v19, 0.0 }
  0xb3   :  { %v165_v20 = vpop.f32.mrf.mxu0 }
  0xb4   :  { %v166_v21 = vadd.f32 %v368_v18, %v165_v20 }
  0xb6   :  { %v169_v23 = vmax.f32 %v166_v21, 0.0 }
  0xb8   :  { %v172_v24 = vpack.c.bf16 %v169_v23, %v168_v22 }
  0xba   :  { %245 = vmatmul.bf16.vlgmr.msra.gmra.mxu1 %v172_v24 }
 0x137   :  { %v246_v26 = vpop.f32.mrf.mxu1 }
 0x138   :  { %v251_v27 = vadd.f32 %v369_v25, %v246_v26 }
 0x13a   :  { %253 = vst [vmem:[#allocation8] sm:$0xff] %v251_v27 }
 0x13f   :  { %v248_v28 = vpop.f32.mrf.mxu1 }
 0x140   :  { %v252_v29 = vadd.f32 %v369_v25, %v248_v28 }
 0x142   :  { %254 = vst [vmem:[#allocation8 + $0x8] sm:$0xff] %v252_v29 }
 0x143   :  { %267 = dma.vmem_to_hbm [thread:$0]  %s260_s12, 256, %s262_s2, [#allocation4], %s478_s15, %s478_s15, %s479_s16  }
 0x144   :  { %470 = dma.done.wait [#allocation4], 256  }
 0x145   :  { %471 = vsyncadd [#allocation4], 4294967040 }
 0x146   :  { %272 = vsyncpa [#allocation3], 1 }
 0x147   :  { %273 = vsyncpa [#allocation6], 1 }
 0x148   :  { %274 = vsyncpa [#allocation4], 1 }

</bundles_post_ra>
